<compile_context>
chip_gen: v7x
topology: tpu7x:2x2x1
jax: 0.10.0
libtpu: 0.0.40
codegen_flags: <defaults>
</compile_context>

<pallas_src>
import jax
import jax.numpy as jnp
from jax.experimental import pallas as pl
from jax.experimental.pallas import tpu as pltpu


def _round_up(x, m):
    return (x + m - 1) // m * m


def gated_cnn_kernel(xp_ref, w_ref, out_ref):
    # xp_ref : (1, L_pad + K - 1, H_in)  bf16 zero-padded input, one batch element
    # w_ref  : (K, H_in, 2 * Hp)         bf16 fused [conv | gate] weights per tap
    # out_ref: (1, TILE_L, Hp)           f32 output tile
    tile_l = out_ref.shape[1]
    hp = out_ref.shape[2]
    k_taps = w_ref.shape[0]
    halo = k_taps - 1

    if xp_ref.shape[1] == tile_l + halo:
        # Single L-tile: the whole padded slab, purely static addressing.
        window = xp_ref[0, :, :]
    else:
        # Multiple L-tiles: one aligned dynamic load of (tile + halo) rows;
        # the per-tap shifts below stay static.
        base = pl.multiple_of(pl.program_id(1) * tile_l, tile_l)
        window = xp_ref[0, pl.ds(base, tile_l + halo), :]

    # K is small & static -> unrolled tap loop, one wide MXU matmul per tap,
    # f32 accumulation in registers.
    acc = jnp.dot(window[0:tile_l, :], w_ref[0],
                  preferred_element_type=jnp.float32)
    for k in range(1, k_taps):
        acc = acc + jnp.dot(window[k:k + tile_l, :], w_ref[k],
                            preferred_element_type=jnp.float32)

    a = acc[:, :hp]                                   # conv path   (f32)
    b = acc[:, hp:]                                   # gate path   (f32)
    gate = pl.reciprocal(1.0 + jnp.exp(-b), approx=True)   # sigmoid via EUP
    out_ref[0] = (a * gate).astype(out_ref.dtype)


def gated_cnn(x, w_conv, w_gate, *, tile_l=512):
    """x: [B, L, H] float32. w_conv / w_gate: [H_out, H_in, K] (PyTorch Conv1d layout)."""
    B, L, H = x.shape
    Hout, Hin, K = w_conv.shape
    assert Hin == H and Hout == H and w_gate.shape == w_conv.shape
    assert K % 2 == 1, "torch 'same' padding in the module assumes odd kernel_size"
    pad = (K - 1) // 2

    # ---- L tiling ---------------------------------------------------------
    if L >= tile_l:
        TL = _round_up(tile_l, 16)            # keep bf16 sublane alignment
    else:
        TL = _round_up(L, 8)                  # single tile
    nt = pl.cdiv(L, TL)
    L_pad = nt * TL
    Lp = L_pad + 2 * pad                      # haloed, tile-rounded length

    # ---- lane-dense output columns -----------------------------------------
    Hp = _round_up(H, 128)

    # Glue (fuses into one XLA copy each): zero-pad + bf16 cast of the
    # activations; reorder/fuse/pad + bf16 cast of the weights.
    xp = jnp.pad(x, ((0, 0), (pad, pad + (L_pad - L)), (0, 0))).astype(jnp.bfloat16)

    wc = jnp.transpose(w_conv, (2, 1, 0))     # [K, H_in, H_out]
    wg = jnp.transpose(w_gate, (2, 1, 0))
    if Hp != H:
        zp = ((0, 0), (0, 0), (0, Hp - H))
        wc = jnp.pad(wc, zp)
        wg = jnp.pad(wg, zp)
    w = jnp.concatenate([wc, wg], axis=-1).astype(jnp.bfloat16)   # [K, H, 2*Hp]

    # VMEM budget: stay well below the local chip's physical VMEM
    # (64 MiB on v7x, 128 MiB on v5e/v6e).
    try:
        vmem_cap = pltpu.get_tpu_info().vmem_capacity_bytes
    except Exception:
        vmem_cap = 64 * 1024 * 1024
    vmem_limit = min(int(vmem_cap * 3 // 4), 112 * 1024 * 1024)

    out = pl.pallas_call(
        gated_cnn_kernel,
        out_shape=jax.ShapeDtypeStruct((B, L_pad, Hp), x.dtype),
        grid_spec=pltpu.PrefetchScalarGridSpec(
            num_scalar_prefetch=0,
            grid=(B, nt),
            in_specs=[
                # Padded activations: resident per batch element (block index
                # constant over the L-tile axis -> no re-DMA per tile).
                pl.BlockSpec((1, Lp, H), lambda b, t: (b, 0, 0)),
                # Fused weights: constant block index -> fetched once.
                pl.BlockSpec((K, H, 2 * Hp), lambda b, t: (0, 0, 0)),
            ],
            out_specs=pl.BlockSpec((1, TL, Hp), lambda b, t: (b, t, 0)),
        ),
        compiler_params=pltpu.CompilerParams(
            dimension_semantics=("parallel", "parallel"),
            vmem_limit_bytes=vmem_limit,
        ),
    )(xp, w)

    # Strip the L rounding and the lane padding of the hidden dim.
    return out[:, :L, :H]


def gated_cnn_ref(x, w_conv, w_gate):
    """Pure-JAX f32 reference matching the torch semantics."""
    B, L, H = x.shape
    K = w_conv.shape[-1]
    pad = (K - 1) // 2
    xp = jnp.pad(x, ((0, 0), (pad, pad), (0, 0)))

    def conv1d(w):
        # out[b, t, o] = sum_{i,k} w[o, i, k] * xp[b, t + k, i]
        return sum(
            jnp.einsum("bti,oi->bto", xp[:, k:k + L, :], w[:, :, k])
            for k in range(K)
        )

    a = conv1d(w_conv)
    b = conv1d(w_gate)
    return a * jax.nn.sigmoid(b)


if __name__ == "__main__":
    # Small shapes consistent with the module: x [batch, length, hidden_size].
    batch, length, hidden, ksize = 2, 16, 32, 3

    key = jax.random.PRNGKey(0)
    kx, kc, kg = jax.random.split(key, 3)

    x = jax.random.normal(kx, (batch, length, hidden), dtype=jnp.float32)
    # Deterministic synthetic Conv1d weights [out_ch, in_ch, kernel_size], no bias.
    fan_in = hidden * ksize
    bound = 1.0 / (fan_in ** 0.5)
    w_conv = jax.random.uniform(kc, (hidden, hidden, ksize), jnp.float32, -bound, bound)
    w_gate = jax.random.uniform(kg, (hidden, hidden, ksize), jnp.float32, -bound, bound)

    out = gated_cnn(x, w_conv, w_gate)
    out = jax.block_until_ready(out)

    ref = gated_cnn_ref(x, w_conv, w_gate)
    assert out.shape == (batch, length, hidden)
    # bf16 matmul inputs (f32 accumulation) -> bf16-level tolerance vs f32 ref.
    assert jnp.allclose(out, ref, atol=3e-2, rtol=3e-2), "mismatch vs reference"

    print("KERNEL_OK")
</pallas_src>

<mosaic_0001>
module attributes {stable_mosaic.version = 11 : i64} {
  func.func @gated_cnn_kernel(%arg0: i32, %arg1: i32, %arg2: memref<1x18x32xbf16, #tpu.memory_space<vmem>>, %arg3: memref<3x32x256xbf16, #tpu.memory_space<vmem>>, %arg4: memref<1x16x128xf32, #tpu.memory_space<vmem>>) attributes {dimension_semantics = [#tpu.dimension_semantics<parallel>, #tpu.dimension_semantics<parallel>], iteration_bounds = array<i64: 2, 1>, scalar_prefetch = 0 : i64, scratch_operands = 0 : i64, tpu.core_type = #tpu.core_type<tc>, window_params = [{transform_indices = @transform_0, window_bounds = array<i64: 1, 18, 32>}, {pipeline_mode = #tpu.pipeline_mode<synchronous>, transform_indices = @transform_1, window_bounds = array<i64: 3, 32, 256>}, {transform_indices = @transform_2, window_bounds = array<i64: 1, 16, 128>}]} {
    %c0 = arith.constant 0 : index
    %c0_0 = arith.constant 0 : index
    %c0_1 = arith.constant 0 : index
    %0 = vector.load %arg2[%c0, %c0_0, %c0_1] : memref<1x18x32xbf16, #tpu.memory_space<vmem>>, vector<1x18x32xbf16>
    %1 = vector.shape_cast %0 : vector<1x18x32xbf16> to vector<18x32xbf16>
    %2 = vector.extract_strided_slice %1 {offsets = [0, 0], sizes = [16, 32], strides = [1, 1]} : vector<18x32xbf16> to vector<16x32xbf16>
    %c0_2 = arith.constant 0 : index
    %c0_3 = arith.constant 0 : index
    %c0_4 = arith.constant 0 : index
    %3 = vector.load %arg3[%c0_2, %c0_3, %c0_4] : memref<3x32x256xbf16, #tpu.memory_space<vmem>>, vector<1x32x256xbf16>
    %4 = vector.shape_cast %3 : vector<1x32x256xbf16> to vector<32x256xbf16>
    %cst = arith.constant dense<0.000000e+00> : vector<16x256xf32>
    %5 = tpu.matmul %2, %4, %cst {dimension_numbers = #tpu.dot_dimension_numbers<[1], [0], [0], [1], [0, 0, 1, 1], [], []>} : vector<16x32xbf16>, vector<32x256xbf16>, vector<16x256xf32> -> vector<16x256xf32>
    %6 = vector.extract_strided_slice %1 {offsets = [1, 0], sizes = [16, 32], strides = [1, 1]} : vector<18x32xbf16> to vector<16x32xbf16>
    %c1 = arith.constant 1 : index
    %c0_5 = arith.constant 0 : index
    %c0_6 = arith.constant 0 : index
    %7 = vector.load %arg3[%c1, %c0_5, %c0_6] : memref<3x32x256xbf16, #tpu.memory_space<vmem>>, vector<1x32x256xbf16>
    %8 = vector.shape_cast %7 : vector<1x32x256xbf16> to vector<32x256xbf16>
    %cst_7 = arith.constant dense<0.000000e+00> : vector<16x256xf32>
    %9 = tpu.matmul %6, %8, %cst_7 {dimension_numbers = #tpu.dot_dimension_numbers<[1], [0], [0], [1], [0, 0, 1, 1], [], []>} : vector<16x32xbf16>, vector<32x256xbf16>, vector<16x256xf32> -> vector<16x256xf32>
    %10 = arith.addf %5, %9 : vector<16x256xf32>
    %11 = vector.extract_strided_slice %1 {offsets = [2, 0], sizes = [16, 32], strides = [1, 1]} : vector<18x32xbf16> to vector<16x32xbf16>
    %c2 = arith.constant 2 : index
    %c0_8 = arith.constant 0 : index
    %c0_9 = arith.constant 0 : index
    %12 = vector.load %arg3[%c2, %c0_8, %c0_9] : memref<3x32x256xbf16, #tpu.memory_space<vmem>>, vector<1x32x256xbf16>
    %13 = vector.shape_cast %12 : vector<1x32x256xbf16> to vector<32x256xbf16>
    %cst_10 = arith.constant dense<0.000000e+00> : vector<16x256xf32>
    %14 = tpu.matmul %11, %13, %cst_10 {dimension_numbers = #tpu.dot_dimension_numbers<[1], [0], [0], [1], [0, 0, 1, 1], [], []>} : vector<16x32xbf16>, vector<32x256xbf16>, vector<16x256xf32> -> vector<16x256xf32>
    %15 = arith.addf %10, %14 : vector<16x256xf32>
    %16 = vector.extract_strided_slice %15 {offsets = [0, 0], sizes = [16, 128], strides = [1, 1]} : vector<16x256xf32> to vector<16x128xf32>
    %17 = vector.extract_strided_slice %15 {offsets = [0, 128], sizes = [16, 128], strides = [1, 1]} : vector<16x256xf32> to vector<16x128xf32>
    %cst_11 = arith.constant 0.000000e+00 : f32
    %18 = vector.broadcast %cst_11 : f32 to vector<16x128xf32>
    %19 = arith.subf %18, %17 : vector<16x128xf32>
    %20 = math.exp %19 : vector<16x128xf32>
    %cst_12 = arith.constant 1.000000e+00 : f32
    %21 = vector.broadcast %cst_12 : f32 to vector<16x128xf32>
    %22 = arith.addf %21, %20 : vector<16x128xf32>
    %23 = tpu.reciprocal %22 {approx = true} : vector<16x128xf32> -> vector<16x128xf32>
    %24 = arith.mulf %16, %23 : vector<16x128xf32>
    %c0_13 = arith.constant 0 : index
    %c0_14 = arith.constant 0 : index
    %c0_15 = arith.constant 0 : index
    %25 = vector.load %arg4[%c0_13, %c0_14, %c0_15] : memref<1x16x128xf32, #tpu.memory_space<vmem>>, vector<1x16x128xf32>
    %26 = vector.shape_cast %25 : vector<1x16x128xf32> to vector<16x128xf32>
    %27 = vector.shape_cast %24 : vector<16x128xf32> to vector<1x16x128xf32>
    tpu.vector_store %arg4[%c0_13, %c0_14, %c0_15], %27 {strides = array<i32>} : memref<1x16x128xf32, #tpu.memory_space<vmem>>, vector<1x16x128xf32>,
    return
  }
  func.func @transform_0(%arg0: i32, %arg1: i32) -> (i32, i32, i32) {
    %c0_i32 = arith.constant 0 : i32
    %c0_i32_0 = arith.constant 0 : i32
    %c0_i32_1 = arith.constant 0 : i32
    return %arg0, %c0_i32, %c0_i32_0 : i32, i32, i32
  }
  func.func @transform_1(%arg0: i32, %arg1: i32) -> (i32, i32, i32) {
    %c0_i32 = arith.constant 0 : i32
    %c0_i32_0 = arith.constant 0 : i32
    %c0_i32_1 = arith.constant 0 : i32
    %c0_i32_2 = arith.constant 0 : i32
    return %c0_i32, %c0_i32_0, %c0_i32_1 : i32, i32, i32
  }
  func.func @transform_2(%arg0: i32, %arg1: i32) -> (i32, i32, i32) {
    %c0_i32 = arith.constant 0 : i32
    %c0_i32_0 = arith.constant 0 : i32
    return %arg0, %arg1, %c0_i32 : i32, i32, i32
  }
}

</mosaic_0001>

<bundles_post_ra>
// kernel: tpu_custom_call.1
= control target key start
LH: loop header
LB: loop body
LE: loop exit
PB: predicated region body
PF: predicated region fallthrough
CT: control target
= control target key end

     0   :  { %7 = vsyncpa [#allocation3], 0  ;;  %s962_s0 = inlined_call_operand.vmem [shape: bf16[2,18,32], index: 0, kind: input, shape index: {}]   ;;  %s963_s1 = inlined_call_operand.hbm [shape: bf16[3,32,256], index: 1, kind: input, shape index: {}]   ;;  %s964_s2 = inlined_call_operand.hbm [shape: f32[2,16,128], index: 2, kind: output, shape index: {}]  }
   0x1   :  { %8 = vsyncpa [#allocation4], 0 }
   0x2   :  { %10 = vsyncpa [#allocation4 + $0x1], 0  ;;  %s806_s9 = smov 0   ;;  %s808_s10 = smov 0  }
   0x3   :  { %s810_s11 = smov 0   ;;  %s812_s12 = smov 0  }
   0x4   :  { %s814_s13 = smov 0   ;;  %s816_s14 = smov 0  }
   0x5 LB: > { %s532_s15 = sadd.s32 4294967295, %s782_s14   ;;  %s533_s16 = sadd.s32 4294967294, %s782_s14   ;;  %s782_s14 = sphi %s816_s14, %s16_s14   ;;  %s778_s13 = sphi %s814_s13, %s982_s13   ;;  %s774_s12 = sphi %s812_s12, %s981_s12   ;;  %s770_s11 = sphi %s810_s11, %s980_s11   ;;  %s766_s10 = sphi %s808_s10, %s979_s10   ;;  %s762_s9 = sphi %s806_s9, %s978_s9  }
   0x6   : > { %s28_s17 = sadd.s32 1, %s778_s13  ;;  %s84_s18 = sadd.s32 1, %s770_s11 }
   0x7   : > { %p30_p0 = scmp.ge.s32.totalorder %s28_s17, 2  ;;  %p94_p1 = scmp.ne.s32.totalorder %s770_s11, %s766_s10 }
   0x8   : > { %p95_p2 = scmp.eq.s32.totalorder %s532_s15, 1  ;;  %p100_p3 = scmp.ne.s32.totalorder %s766_s10, %s762_s9 }
   0x9   : > { %s984_s17 = smov (%p30_p0, %s28_s17), 0  ;;  %p101_p5 = scmp.eq.s32.totalorder %s533_s16, 1 }
   0xa   : > { %p846_p4 = por %p95_p2, %p94_p1  ;;  %s79_s20 = ssub.s32 %s778_s13, %s984_s17 }
   0xb   : > { %p534_p6 = scmp.ge.s32.totalorder %s782_s14, 1  ;;  %p82_p7 = scmp.eq.s32.totalorder %s79_s20, 0 }
   0xc   : > { %s969_s19 = scalar_select %p846_p4, 1, 0 }
   0xd   : > { %p853_p8 = por %p101_p5, %p100_p3  ;;  %p108_p9 = scmp.lt.s32.totalorder %s782_s14, 3 }
   0xe   : > { %s859_s22 = scalar_select %p82_p7, %s770_s11, %s84_s18  }
   0xf   : > { %s970_s21 = scalar_select %p853_p8, 1, 0 }
  0x10   : > { %p861_p10 = pnand %p534_p6, %p108_p9  ;;  %p865_p11 = scmp.eq.s32.totalorder %s532_s15, 0 }
  0x11   : > { %s784_s25 = smov [#allocation2]   ;;  %s672_s30 = scalar_lea.hbm %s963_s1, 1536 }
  0x12   : > { %s971_s23 = scalar_select %p861_p10, 1, 0 }
  0x13   : > { %s972_s24 = scalar_select %p865_p11, 1, 0 }
  0x14   : > { %p579_p12 = pneg %p861_p10  ;;  %s120_s26 = sshll.u32 %s784_s25, 4  ;;  %s121_s26 = int_to_ptr.vmem [resolvable:$true] %s120_s26 }
  0x15   : > { %p673_p0 = scmp.ne.s32.totalorder %s963_s1, %s672_s30  ;;  %p679_p5 = scmp.lt.u32.totalorder %s672_s30, %s963_s1 }
  0x16   : > { %p873_p13 = pnand %p865_p11, %p579_p12 }
  0x18   : > { %p674_p1 = pneg %p873_p13 }
  0x1a   : > { %p675_p2 = pnand %p674_p1, %p673_p0 }
  0x1c   : > { %p676_p3 = pneg %p675_p2 }
  0x1e   : > { %p681_p6 = pnand %p679_p5, %p676_p3 }
  0x20   : > { %684 = shalt.err (!%p681_p6)
}
  0x21   : > { %s685_s7 = scalar_lea.vmem %s121_s26, 1536  ;;  %p693_p8 = scmp.lt.s32.totalorder %s121_s26, %s121_s26 }
  0x22   : > { %p686_p7 = scmp.ne.s32.totalorder %s121_s26, %s685_s7  ;;  %p694_p4 = scmp.lt.s32.totalorder %s685_s7, %s685_s7 }
  0x24   : > { %p688_p9 = pnand %p686_p7, %p674_p1  ;;  %p695_p11 = por %p694_p4, %p693_p8 }
  0x26   : > { %p689_p12 = pneg %p688_p9 }
  0x28   : > { %p696_p10 = pnand %p695_p11, %p689_p12 }
  0x2a   : > { %699 = shalt.err (!%p696_p10)
}
  0x2b   : > { %s785_s8 = smov 128   ;;  %s786_s15 = smov 8  }
  0x2c   : > { %582 = dma.hbm_to_vmem [thread:$0]  (!%p873_p13), %s963_s1, 1536, %s121_s26, [#allocation3], %s785_s8, %s785_s8, %s786_s15  }
  0x2d   : > { %p974_p0 = scmp.ne.s32.totalorder %s971_s23, 0 }
  0x2e   : > { %p975_p2 = scmp.ne.s32.totalorder (!%p974_p0), %s972_s24, 0 }
  0x2f   : > { %144 = sbr.rel (%p974_p0) target bundleno = 339 (0x153), region = 28 }
  0x36   : > { %753 = dma.done.wait (%p975_p2), [#allocation3], 1536  }
  0x37   : > { %755 = vsyncadd (%p975_p2), [#allocation3], 4294965760  ;;  %p166_p4 = scmp.lt.s32.totalorder %s774_s12, 1  ;;  %v787_v0 = vmov 0   ;;  %v644_v1 = vld [vmem:[#allocation2 + $0x4] ss:$8 sps:$4 sm:$0xff]  }
  0x38   : > { %327 = vmatprep.mubr.bf16.mxu0 %v787_v0  ;;  %262 = vmatprep.mubr.bf16.mxu1 %v787_v0  ;;  %v646_v2 = vld [vmem:[#allocation2] ss:$8 sps:$4 sm:$0xff]   ;;  %v647_v3 = vld [vmem:[#allocation2 + $0x14] ss:$8 sps:$4 sm:$0xff]   ;;  %v649_v4 = vld [vmem:[#allocation2 + $0x10] ss:$8 sps:$4 sm:$0xff]  }
  0x39   : > { %s167_s20 = scalar_select %p166_p4, %s774_s12, 1  ;;  %295 = vmatprep.subr.bf16.mxu0 %v644_v1  ;;  %v653_v6 = vld [vmem:[#allocation2 + $0x44] ss:$8 sps:$4 sm:$0xff]   ;;  %v651_v7 = vld [vmem:[#allocation2 + $0x40] ss:$8 sps:$4 sm:$0xff]   ;;  %vm226_vm0 = vcmask 261120  }
  0x3a   : > { %296 = vmatpush1.bf16.msra.mxu0 %v646_v2  ;;  %v654_v8 = vld [vmem:[#allocation2 + $0x24] ss:$8 sps:$4 sm:$0xff]   ;;  %v656_v10 = vld [vmem:[#allocation2 + $0x20] ss:$8 sps:$4 sm:$0xff]   ;;  %v657_v11 = vld [vmem:[#allocation2 + $0x34] ss:$8 sps:$4 sm:$0xff]  }
  0x3b   : > { %s572_s25 = smul.u32 12, %s167_s20  ;;  %297 = vmatprep.subr.bf16.mxu0 %v647_v3  ;;  %230 = vmatprep.subr.bf16.mxu1 %v654_v8  ;;  %v661_v14 = vld [vmem:[#allocation2 + $0x54] ss:$8 sps:$4 sm:$0xff]   ;;  %v662_v15 = vld [vmem:[#allocation2 + $0x30] ss:$8 sps:$4 sm:$0xff]   ;;  %vm343_vm2 = vcmask 1046528  }
  0x3c   : > { %231 = vmatpush1.bf16.msra.mxu1 %v656_v10  ;;  %v659_v17 = vld [vmem:[#allocation2 + $0x50] ss:$8 sps:$4 sm:$0xff]   ;;  %vm193_vm1 = vsmask.f32 7424  ;;  %s163_s24 = sand.u32 1, %s766_s10   ;;  %s563_s29 = sshll.u32 %s774_s12, 8 }
  0x3d   : > { %s170_s23 = scalar_lea.vmem %s962_s0, %s572_s25  ;;  %232 = vmatprep.subr.bf16.mxu1 %v657_v11  ;;  %s539_s28 = sshll.u32 %s163_s24, 4 }
  0x3e   : > { %v650_v5 = vld [vmem:[%s170_s23] sm:$0xff]   ;;  %298 = vmatpush1.bf16.msra.mxu0 %v649_v4  ;;  %v663_v16 = vld [vmem:[%s170_s23 + $0x8] ss:$0 sps:$4 sm:$0x11]   ;;  %s165_s30 = scalar_lea.vmem [#allocation5], %s539_s28  ;;  %s912_s6 = scalar_lea.hbm %s964_s2, %s563_s29 }
  0x3f   : > { %v197_v9 = vshll.u32 %v650_v5, 16  ;;  %v195_v12 = vshrl.u32 %v650_v5, 16  ;;  %370 = vmatprep.subr.bf16.mxu0 %v653_v6  ;;  %v202_v19 = vshll.u32 %v663_v16, 16  ;;  %v344_v22 = vrot.slane %v650_v5, 1  ;;  %s447_s3 = sshll.u32 %s165_s30, 4  ;;  %s916_s7 = scalar_lea.sflag [#allocation4], %s163_s24  ;;  %s914_s3 = int_to_ptr.vmem [resolvable:$true] %s447_s3 }
  0x40   : > { %233 = vmatpush1.bf16.msra.mxu1 %v662_v15  ;;  %v345_v23 = vrot.slane %v663_v16, 1  ;;  %s700_s12 = scalar_lea.vmem %s914_s3, 256  ;;  %p976_p10 = scmp.ne.s32.totalorder %s969_s19, 0 }
  0x41   : > { %v199_v13 = vrot.slane %v197_v9, 1  ;;  %552 = vmatmul.mubr.msk.bf16.vlgmr.msra.gmra.mrb[0].mxu0 %vm226_vm0, %v650_v5  ;;  %v204_v20 = vrot.slane %v202_v19, 1  ;;  %p701_p8 = scmp.ne.s32.totalorder %s914_s3, %s700_s12  ;;  %s788_s8 = smov [#allocation5]  }
  0x42   : > { %371 = vmatpush1.bf16.msra.mxu0 %v651_v7  ;;  %402 = vmatprep.mubr.bf16.mxu0 %v787_v0  ;;  %v346_v24 = vsel %vm343_vm2, %v344_v22, %v345_v23  ;;  %s704_s15 = sshll.u32 %s788_s8, 4  ;;  %s705_s15 = int_to_ptr.vmem [resolvable:$false] %s704_s15 }
  0x43   : > { %v200_v18 = vor.u32 %v199_v13, %v195_v12  ;;  %372 = vmatprep.subr.bf16.mxu0 %v661_v14  ;;  %p702_p11 = pnand %p701_p8, %p976_p10  ;;  %s706_s16 = scalar_lea.vmem %s705_s15, 512 }
  0x44   : > { %p707_p1 = scmp.lt.s32.totalorder %s914_s3, %s705_s15  ;;  %p708_p3 = scmp.lt.s32.totalorder %s706_s16, %s700_s12 }
  0x45   : > { %v205_v21 = vsel %vm193_vm1, %v200_v18, %v204_v20  ;;  %p703_p13 = pneg %p702_p11 }
  0x46   : > { %373 = vmatpush1.bf16.msra.mxu0 %v659_v17  ;;  %547 = vmatmul.mubr.msk.bf16.vlgmr.msra.gmra.mrb[0].mxu1 %vm226_vm0, %v205_v21  ;;  %p709_p5 = por %p708_p3, %p707_p1 }
  0x48   : > { %p710_p6 = pnand %p709_p5, %p703_p13 }
  0x4d   : > { %557 = vmatmul.mubr.msk.bf16.vlgmr.msra.gmra.mrb[0].mxu0 %vm226_vm0, %v346_v24 }
 0x119   : > { %v264_v25 = vpop.f32.mrb[0].mxu1 }
 0x11a   : > { %v266_v26 = vpop.f32.mrb[1].mxu1 }
 0x11b   : > { %v268_v27 = vpop.f32.mrb[2].mxu1 }
 0x11c   : > { %v270_v28 = vpop.f32.mrb[3].mxu1 }
 0x120   : > { %v404_v29 = vpop.f32.mrb[0].mxu0 }
 0x121   : > { %v564_v30 = vadd.f32 %v404_v29, %v264_v25  ;;  %v406_v31 = vpop.f32.mrb[1].mxu0 }
 0x122   : > { %v565_v32 = vadd.f32 %v406_v31, %v266_v26  ;;  %v408_v33 = vpop.f32.mrb[2].mxu0 }
 0x123   : > { %v566_v34 = vadd.f32 %v408_v33, %v268_v27  ;;  %v410_v35 = vpop.f32.mrb[3].mxu0 }
 0x124   : > { %v417_v36 = vsub.f32 0.0, %v565_v32  ;;  %v567_v37 = vadd.f32 %v410_v35, %v270_v28 }
 0x126   : > { %v419_v38 = vmul.f32 1.442695, %v417_v36  ;;  %v418_v39 = vsub.f32 0.0, %v567_v37 }
 0x128   : > { %664 = vpow2.f32 %v419_v38  ;;  %v421_v40 = vmul.f32 1.442695, %v418_v39 }
 0x12a   : > { %666 = vpow2.f32 %v421_v40 }
 0x132   : > { %v665_v41 = vpop.eup %664 }
 0x133   : > { %v423_v42 = vadd.f32 1.0, %v665_v41 }
 0x134   : > { %v667_v43 = vpop.eup %666 }
 0x135   : > { %668 = vrcp.f32 %v423_v42  ;;  %v424_v44 = vadd.f32 1.0, %v667_v43 }
 0x137   : > { %670 = vrcp.f32 %v424_v44 }
 0x13f   : > { %v669_v45 = vpop.eup %668 }
 0x140   : > { %v427_v46 = vmul.f32 %v669_v45, %v564_v30 }
 0x141   : > { %v671_v47 = vpop.eup %670 }
 0x142   : > { %v428_v48 = vmul.f32 %v671_v47, %v566_v34  ;;  %429 = vst [vmem:[%s165_s30] sm:$0xff] %v427_v46 }
 0x144   : > { %430 = vst [vmem:[%s165_s30 + $0x8] sm:$0xff] %v428_v48 }
 0x145   : > { %713 = shalt.err (!%p710_p6)
}
 0x146   : > { %s714_s18 = scalar_lea.hbm %s912_s6, 256  ;;  %s718_s27 = scalar_lea.hbm %s964_s2, 512 }
 0x147   : > { %p715_p7 = scmp.ne.s32.totalorder %s912_s6, %s714_s18  ;;  %p719_p0 = scmp.lt.u32.totalorder %s912_s6, %s964_s2 }
 0x148   : > { %p720_p2 = scmp.lt.u32.totalorder %s718_s27, %s714_s18  ;;  %p722_p8 = scmp.lt.u32.totalorder %s714_s18, %s912_s6 }
 0x149   : > { %p716_p9 = pnand %p715_p7, %p976_p10 }
 0x14a   : > { %p721_p4 = por %p720_p2, %p719_p0 }
 0x14b   : > { %p717_p12 = pneg %p716_p9 }
 0x14c   : > { %p723_p11 = por %p722_p8, %p721_p4 }
 0x14e   : > { %p724_p13 = pnand %p723_p11, %p717_p12 }
 0x150   : > { %727 = shalt.err (!%p724_p13)
}
 0x151   : > { %s789_s24 = smov 128   ;;  %s790_s28 = smov 8  }
 0x152   : > { %577 = dma.vmem_to_hbm [thread:$0]  (%p976_p10), %s914_s3, 256, %s912_s6, %s916_s7, %s789_s24, %s789_s24, %s790_s28  }
 0x153 PF: > { %p589_p1 = scmp.ge.s32.totalorder %s782_s14, 2  ;;  %s462_s29 = sand.u32 1, %s762_s9  }
 0x154   : > { %p977_p3 = scmp.ne.s32.totalorder %s970_s21, 0  ;;  %s463_s30 = scalar_lea.sflag [#allocation4], %s462_s29 }
 0x156   : > { %p584_p5 = pnand %p589_p1, %p977_p3 }
 0x158   : > { %757 = dma.done.wait (!%p584_p5), %s463_s30, 256  }
 0x159   : > { %759 = vsyncadd (!%p584_p5), %s463_s30, 4294967040  ;;  %s16_s14 = sadd.s32 1, %s782_s14   ;;  %s978_s9 = smov %s766_s10 }
 0x15a   : > { %p13_p6 = scmp.ge.s32.totalorder %s16_s14, 4   ;;  %s979_s10 = smov %s770_s11 }
 0x15b   : > { %s980_s11 = smov %s859_s22  ;;  %s981_s12 = smov %s778_s13 }
 0x15c   : > { %s982_s13 = smov %s984_s17  ;;  %15 = sbr.rel (!%p13_p6) target bundleno = 5 (0x5), region = 70 }
 0x163   :  { %468 = vsyncpa [#allocation3], 1 }
 0x164   :  { %470 = vsyncpa [#allocation3 + $0x1], 1 }
 0x165   :  { %471 = vsyncpa [#allocation4], 1 }
 0x166   :  { %473 = vsyncpa [#allocation4 + $0x1], 1 }

</bundles_post_ra>
